<compile_context>
chip_gen: v7x
topology: tpu7x:2x2x1
jax: 0.10.0
libtpu: 0.0.40
codegen_flags: <defaults>
</compile_context>

<pallas_src>
import functools
import math

import jax
import jax.numpy as jnp
from jax import lax
from jax.experimental import pallas as pl
from jax.experimental.pallas import tpu as pltpu


def _attention_kernel(x_ref, m_ref, wq_ref, bq_ref, wk_ref, bk_ref,
                      wv_ref, bv_ref, o_ref, *, hidden_size, batch, sq, sk):
    """One grid step handles `batch` batch elements entirely in VMEM.

    x_ref:   (batch*Sq, Din) bf16   flattened queries input
    m_ref:   (batch*Sk, Din) bf16   flattened memory input
    wq_ref:  (Din, H) bf16 (scale pre-folded), bq_ref: (1, H) f32 (scale pre-folded)
    wk_ref:  (Din, H) bf16, bk_ref: (1, H) f32
    wv_ref:  (Din, H) bf16, bv_ref: (1, H) f32
    o_ref:   (batch*Sq, H) f32
    """
    cdt = jnp.bfloat16  # matmul operand dtype; accumulation stays f32

    x = x_ref[...]       # already bf16
    mem = m_ref[...]     # already bf16

    # Projections: bf16 operands, f32 accumulation. 1/sqrt(H) is already folded
    # into Wq / bq, so q carries the softmax scale.
    q2 = jnp.dot(x, wq_ref[...], preferred_element_type=jnp.float32) + bq_ref[...]
    k2 = jnp.dot(mem, wk_ref[...], preferred_element_type=jnp.float32) + bk_ref[...]
    v2 = jnp.dot(mem, wv_ref[...], preferred_element_type=jnp.float32) + bv_ref[...]

    q = q2.reshape(batch, sq, hidden_size).astype(cdt)   # (bt, Sq, H)
    k = k2.reshape(batch, sk, hidden_size).astype(cdt)   # (bt, Sk, H)
    v = v2.reshape(batch, sk, hidden_size).astype(cdt)   # (bt, Sk, H)

    # Scaled scores: batched q @ k^T contracting last axes (no transpose).
    scores = lax.dot_general(
        q, k,
        dimension_numbers=(((2,), (2,)), ((0,), (0,))),
        preferred_element_type=jnp.float32)               # (bt, Sq, Sk), f32

    # Numerically stable softmax in f32; reciprocal goes to the EUP slot.
    scores = scores - jnp.max(scores, axis=-1, keepdims=True)
    e = jnp.exp(scores)
    p = e * pl.reciprocal(jnp.sum(e, axis=-1, keepdims=True), approx=True)

    # Weighted sum of values: batched p @ v.
    out = lax.dot_general(
        p.astype(cdt), v,
        dimension_numbers=(((2,), (1,)), ((0,), (0,))),
        preferred_element_type=jnp.float32)                # (bt, Sq, H)

    o_ref[...] = out.reshape(batch * sq, hidden_size).astype(o_ref.dtype)


def attention_forward(x, memory, wq, bq, wk, bk, wv, bv, *, batch_block=None):
    """x: (B, Sq, Din), memory: (B, Sk, Din); weights (Din, H), biases (1, H)."""
    B, Sq, Din = x.shape
    _, Sk, _ = memory.shape
    H = wq.shape[1]

    # Default: 2+ grid steps so input DMA overlaps compute and v7x's second
    # TensorCore gets work via dimension_semantics=("parallel",).
    if batch_block is None:
        batch_block = B // 2 if (B % 2 == 0 and B >= 2) else B
    assert B % batch_block == 0, "batch_block must divide B"
    n_steps = B // batch_block

    # Bake the softmax scale into the query projection (f32, then cast).
    scale = 1.0 / math.sqrt(float(H))
    cdt = jnp.bfloat16
    wq_b = (wq.astype(jnp.float32) * scale).astype(cdt)
    bq_f = (bq.astype(jnp.float32) * scale)
    wk_b = wk.astype(cdt)
    wv_b = wv.astype(cdt)
    bk_f = bk.astype(jnp.float32)
    bv_f = bv.astype(jnp.float32)

    # Fold batch into the matmul M dimension; ship activations as bf16 so the
    # HBM->VMEM DMA moves half the bytes.
    x2d = x.reshape(B * Sq, Din).astype(cdt)
    m2d = memory.reshape(B * Sk, Din).astype(cdt)

    kernel = functools.partial(_attention_kernel, hidden_size=H,
                               batch=batch_block, sq=Sq, sk=Sk)

    grid_spec = pltpu.PrefetchScalarGridSpec(
        num_scalar_prefetch=0,
        grid=(n_steps,),
        in_specs=[
            pl.BlockSpec((batch_block * Sq, Din), lambda i: (i, 0)),   # x (flattened, bf16)
            pl.BlockSpec((batch_block * Sk, Din), lambda i: (i, 0)),   # memory (flattened, bf16)
            pl.BlockSpec((Din, H), lambda i: (0, 0)),                  # Wq (scale folded)
            pl.BlockSpec((1, H), lambda i: (0, 0)),                    # bq (scale folded)
            pl.BlockSpec((Din, H), lambda i: (0, 0)),                  # Wk
            pl.BlockSpec((1, H), lambda i: (0, 0)),                    # bk
            pl.BlockSpec((Din, H), lambda i: (0, 0)),                  # Wv
            pl.BlockSpec((1, H), lambda i: (0, 0)),                    # bv
        ],
        out_specs=pl.BlockSpec((batch_block * Sq, H), lambda i: (i, 0)),
    )

    out2d = pl.pallas_call(
        kernel,
        out_shape=jax.ShapeDtypeStruct((B * Sq, H), jnp.float32),
        grid_spec=grid_spec,
        compiler_params=pltpu.CompilerParams(
            dimension_semantics=("parallel",),
            # 48 MiB: safe on v5e/v6e (128 MiB physical) and leaves headroom on
            # v7x's 64 MiB per-TC VMEM.
            vmem_limit_bytes=48 * 1024 * 1024),
    )(x2d, m2d, wq_b, bq_f, wk_b, bk_f, wv_b, bv_f)

    # TODO(synk): for realistic Sq/Sk/H sizes, pad Din/H/Sk to multiples of 128
    # (masking padded keys to -inf) and replace the monolithic resident block
    # with Sq/Sk tiling + online-softmax accumulators (flash pattern) so the
    # live f32 score tensors stay small; mandatory on v7x's 64 MiB VMEM.
    return out2d.reshape(B, Sq, H)


def _reference(x, memory, wq, bq, wk, bk, wv, bv):
    """Pure-JAX f32 reference mirroring the PyTorch forward exactly."""
    H = wq.shape[1]
    q = jnp.einsum("bsd,dh->bsh", x, wq) + bq[0]
    k = jnp.einsum("bsd,dh->bsh", memory, wk) + bk[0]
    v = jnp.einsum("bsd,dh->bsh", memory, wv) + bv[0]
    scores = jnp.einsum("bqh,bkh->bqk", q, k) / jnp.sqrt(jnp.float32(H))
    weights = jax.nn.softmax(scores, axis=-1)
    return jnp.einsum("bqk,bkh->bqh", weights, v)


if __name__ == "__main__":
    # Small shapes consistent with the module's forward.
    B, Sq, Sk = 2, 8, 8
    input_size, hidden_size = 32, 32

    key = jax.random.PRNGKey(0)
    kx, km, k1, k2, k3, k4, k5, k6 = jax.random.split(key, 8)

    x = jax.random.normal(kx, (B, Sq, input_size), dtype=jnp.float32)
    memory = jax.random.normal(km, (B, Sk, input_size), dtype=jnp.float32)

    # Deterministic nn.Linear-style init: U(-1/sqrt(fan_in), 1/sqrt(fan_in)).
    bound = 1.0 / math.sqrt(input_size)
    wq = jax.random.uniform(k1, (input_size, hidden_size), jnp.float32, -bound, bound)
    wk = jax.random.uniform(k2, (input_size, hidden_size), jnp.float32, -bound, bound)
    wv = jax.random.uniform(k3, (input_size, hidden_size), jnp.float32, -bound, bound)
    bq = jax.random.uniform(k4, (1, hidden_size), jnp.float32, -bound, bound)
    bk = jax.random.uniform(k5, (1, hidden_size), jnp.float32, -bound, bound)
    bv = jax.random.uniform(k6, (1, hidden_size), jnp.float32, -bound, bound)

    out = attention_forward(x, memory, wq, bq, wk, bk, wv, bv)
    out = jax.block_until_ready(out)

    ref = _reference(x, memory, wq, bq, wk, bk, wv, bv)
    assert out.shape == (B, Sq, hidden_size)
    # bf16 inputs/matmul operands + approx reciprocal -> slightly looser tolerance.
    assert jnp.allclose(out, ref, atol=5e-2, rtol=5e-2), "mismatch vs JAX reference"

    print("KERNEL_OK")
</pallas_src>

<mosaic_0001>
module attributes {stable_mosaic.version = 11 : i64} {
  func.func @_attention_kernel(%arg0: i32, %arg1: memref<8x32xbf16, #tpu.memory_space<vmem>>, %arg2: memref<8x32xbf16, #tpu.memory_space<vmem>>, %arg3: memref<32x32xbf16, #tpu.memory_space<vmem>>, %arg4: memref<1x32xf32, #tpu.memory_space<vmem>>, %arg5: memref<32x32xbf16, #tpu.memory_space<vmem>>, %arg6: memref<1x32xf32, #tpu.memory_space<vmem>>, %arg7: memref<32x32xbf16, #tpu.memory_space<vmem>>, %arg8: memref<1x32xf32, #tpu.memory_space<vmem>>, %arg9: memref<8x32xf32, #tpu.memory_space<vmem>>) attributes {dimension_semantics = [#tpu.dimension_semantics<parallel>], iteration_bounds = array<i64: 2>, scalar_prefetch = 0 : i64, scratch_operands = 0 : i64, tpu.core_type = #tpu.core_type<tc>, window_params = [{transform_indices = @transform_0, window_bounds = array<i64: 8, 32>}, {transform_indices = @transform_1, window_bounds = array<i64: 8, 32>}, {pipeline_mode = #tpu.pipeline_mode<synchronous>, transform_indices = @transform_2, window_bounds = array<i64: 32, 32>}, {pipeline_mode = #tpu.pipeline_mode<synchronous>, transform_indices = @transform_3, window_bounds = array<i64: 1, 32>}, {pipeline_mode = #tpu.pipeline_mode<synchronous>, transform_indices = @transform_4, window_bounds = array<i64: 32, 32>}, {pipeline_mode = #tpu.pipeline_mode<synchronous>, transform_indices = @transform_5, window_bounds = array<i64: 1, 32>}, {pipeline_mode = #tpu.pipeline_mode<synchronous>, transform_indices = @transform_6, window_bounds = array<i64: 32, 32>}, {pipeline_mode = #tpu.pipeline_mode<synchronous>, transform_indices = @transform_7, window_bounds = array<i64: 1, 32>}, {transform_indices = @transform_8, window_bounds = array<i64: 8, 32>}]} {
    %c0 = arith.constant 0 : index
    %c0_0 = arith.constant 0 : index
    %0 = vector.load %arg1[%c0, %c0_0] : memref<8x32xbf16, #tpu.memory_space<vmem>>, vector<8x32xbf16>
    %c0_1 = arith.constant 0 : index
    %c0_2 = arith.constant 0 : index
    %1 = vector.load %arg2[%c0_1, %c0_2] : memref<8x32xbf16, #tpu.memory_space<vmem>>, vector<8x32xbf16>
    %c0_3 = arith.constant 0 : index
    %c0_4 = arith.constant 0 : index
    %2 = vector.load %arg3[%c0_3, %c0_4] : memref<32x32xbf16, #tpu.memory_space<vmem>>, vector<32x32xbf16>
    %cst = arith.constant dense<0.000000e+00> : vector<8x32xf32>
    %3 = tpu.matmul %0, %2, %cst {dimension_numbers = #tpu.dot_dimension_numbers<[1], [0], [0], [1], [0, 0, 1, 1], [], []>} : vector<8x32xbf16>, vector<32x32xbf16>, vector<8x32xf32> -> vector<8x32xf32>
    %c0_5 = arith.constant 0 : index
    %c0_6 = arith.constant 0 : index
    %4 = vector.load %arg4[%c0_5, %c0_6] : memref<1x32xf32, #tpu.memory_space<vmem>>, vector<1x32xf32>
    %5 = vector.broadcast %4 : vector<1x32xf32> to vector<8x32xf32>
    %6 = arith.addf %3, %5 : vector<8x32xf32>
    %c0_7 = arith.constant 0 : index
    %c0_8 = arith.constant 0 : index
    %7 = vector.load %arg5[%c0_7, %c0_8] : memref<32x32xbf16, #tpu.memory_space<vmem>>, vector<32x32xbf16>
    %cst_9 = arith.constant dense<0.000000e+00> : vector<8x32xf32>
    %8 = tpu.matmul %1, %7, %cst_9 {dimension_numbers = #tpu.dot_dimension_numbers<[1], [0], [0], [1], [0, 0, 1, 1], [], []>} : vector<8x32xbf16>, vector<32x32xbf16>, vector<8x32xf32> -> vector<8x32xf32>
    %c0_10 = arith.constant 0 : index
    %c0_11 = arith.constant 0 : index
    %9 = vector.load %arg6[%c0_10, %c0_11] : memref<1x32xf32, #tpu.memory_space<vmem>>, vector<1x32xf32>
    %10 = vector.broadcast %9 : vector<1x32xf32> to vector<8x32xf32>
    %11 = arith.addf %8, %10 : vector<8x32xf32>
    %c0_12 = arith.constant 0 : index
    %c0_13 = arith.constant 0 : index
    %12 = vector.load %arg7[%c0_12, %c0_13] : memref<32x32xbf16, #tpu.memory_space<vmem>>, vector<32x32xbf16>
    %cst_14 = arith.constant dense<0.000000e+00> : vector<8x32xf32>
    %13 = tpu.matmul %1, %12, %cst_14 {dimension_numbers = #tpu.dot_dimension_numbers<[1], [0], [0], [1], [0, 0, 1, 1], [], []>} : vector<8x32xbf16>, vector<32x32xbf16>, vector<8x32xf32> -> vector<8x32xf32>
    %c0_15 = arith.constant 0 : index
    %c0_16 = arith.constant 0 : index
    %14 = vector.load %arg8[%c0_15, %c0_16] : memref<1x32xf32, #tpu.memory_space<vmem>>, vector<1x32xf32>
    %15 = vector.broadcast %14 : vector<1x32xf32> to vector<8x32xf32>
    %16 = arith.addf %13, %15 : vector<8x32xf32>
    %17 = vector.shape_cast %6 : vector<8x32xf32> to vector<1x8x32xf32>
    %18 = arith.truncf %17 : vector<1x8x32xf32> to vector<1x8x32xbf16>
    %19 = vector.shape_cast %11 : vector<8x32xf32> to vector<1x8x32xf32>
    %20 = arith.truncf %19 : vector<1x8x32xf32> to vector<1x8x32xbf16>
    %21 = vector.shape_cast %16 : vector<8x32xf32> to vector<1x8x32xf32>
    %22 = arith.truncf %21 : vector<1x8x32xf32> to vector<1x8x32xbf16>
    %cst_17 = arith.constant dense<0.000000e+00> : vector<1x8x8xf32>
    %23 = tpu.matmul %18, %20, %cst_17 {dimension_numbers = #tpu.dot_dimension_numbers<[2], [2], [1], [1], [0, 0, 0, 1, 1, 1], [0], [0]>} : vector<1x8x32xbf16>, vector<1x8x32xbf16>, vector<1x8x8xf32> -> vector<1x8x8xf32>
    %cst_18 = arith.constant dense<0xFF800000> : vector<1x8xf32>
    %24 = vector.multi_reduction <maximumf>, %23, %cst_18 [2] : vector<1x8x8xf32> to vector<1x8xf32>
    %25 = vector.shape_cast %24 : vector<1x8xf32> to vector<1x8x1xf32>
    %26 = vector.broadcast %25 : vector<1x8x1xf32> to vector<1x8x8xf32>
    %27 = arith.subf %23, %26 : vector<1x8x8xf32>
    %28 = math.exp %27 : vector<1x8x8xf32>
    %cst_19 = arith.constant dense<0.000000e+00> : vector<1x8xf32>
    %29 = vector.multi_reduction <add>, %28, %cst_19 [2] : vector<1x8x8xf32> to vector<1x8xf32>
    %30 = vector.shape_cast %29 : vector<1x8xf32> to vector<1x8x1xf32>
    %31 = tpu.reciprocal %30 {approx = true} : vector<1x8x1xf32> -> vector<1x8x1xf32>
    %32 = vector.broadcast %31 : vector<1x8x1xf32> to vector<1x8x8xf32>
    %33 = arith.mulf %28, %32 : vector<1x8x8xf32>
    %34 = arith.truncf %33 : vector<1x8x8xf32> to vector<1x8x8xbf16>
    %cst_20 = arith.constant dense<0.000000e+00> : vector<1x8x32xf32>
    %35 = tpu.matmul %34, %22, %cst_20 {dimension_numbers = #tpu.dot_dimension_numbers<[2], [1], [1], [2], [0, 0, 0, 1, 1, 2], [0], [0]>} : vector<1x8x8xbf16>, vector<1x8x32xbf16>, vector<1x8x32xf32> -> vector<1x8x32xf32>
    %36 = vector.shape_cast %35 : vector<1x8x32xf32> to vector<8x32xf32>
    %c0_21 = arith.constant 0 : index
    %c0_22 = arith.constant 0 : index
    %37 = vector.load %arg9[%c0_21, %c0_22] : memref<8x32xf32, #tpu.memory_space<vmem>>, vector<8x32xf32>
    tpu.vector_store %arg9[%c0_21, %c0_22], %36 {strides = array<i32>} : memref<8x32xf32, #tpu.memory_space<vmem>>, vector<8x32xf32>,
    return
  }
  func.func @transform_0(%arg0: i32) -> (i32, i32) {
    %c0_i32 = arith.constant 0 : i32
    %c0_i32_0 = arith.constant 0 : i32
    return %arg0, %c0_i32 : i32, i32
  }
  func.func @transform_1(%arg0: i32) -> (i32, i32) {
    %c0_i32 = arith.constant 0 : i32
    %c0_i32_0 = arith.constant 0 : i32
    return %arg0, %c0_i32 : i32, i32
  }
  func.func @transform_2(%arg0: i32) -> (i32, i32) {
    %c0_i32 = arith.constant 0 : i32
    %c0_i32_0 = arith.constant 0 : i32
    %c0_i32_1 = arith.constant 0 : i32
    return %c0_i32, %c0_i32_0 : i32, i32
  }
  func.func @transform_3(%arg0: i32) -> (i32, i32) {
    %c0_i32 = arith.constant 0 : i32
    %c0_i32_0 = arith.constant 0 : i32
    %c0_i32_1 = arith.constant 0 : i32
    return %c0_i32, %c0_i32_0 : i32, i32
  }
  func.func @transform_4(%arg0: i32) -> (i32, i32) {
    %c0_i32 = arith.constant 0 : i32
    %c0_i32_0 = arith.constant 0 : i32
    %c0_i32_1 = arith.constant 0 : i32
    return %c0_i32, %c0_i32_0 : i32, i32
  }
  func.func @transform_5(%arg0: i32) -> (i32, i32) {
    %c0_i32 = arith.constant 0 : i32
    %c0_i32_0 = arith.constant 0 : i32
    %c0_i32_1 = arith.constant 0 : i32
    return %c0_i32, %c0_i32_0 : i32, i32
  }
  func.func @transform_6(%arg0: i32) -> (i32, i32) {
    %c0_i32 = arith.constant 0 : i32
    %c0_i32_0 = arith.constant 0 : i32
    %c0_i32_1 = arith.constant 0 : i32
    return %c0_i32, %c0_i32_0 : i32, i32
  }
  func.func @transform_7(%arg0: i32) -> (i32, i32) {
    %c0_i32 = arith.constant 0 : i32
    %c0_i32_0 = arith.constant 0 : i32
    %c0_i32_1 = arith.constant 0 : i32
    return %c0_i32, %c0_i32_0 : i32, i32
  }
  func.func @transform_8(%arg0: i32) -> (i32, i32) {
    %c0_i32 = arith.constant 0 : i32
    %c0_i32_0 = arith.constant 0 : i32
    return %arg0, %c0_i32 : i32, i32
  }
}

</mosaic_0001>

<bundles_post_ra>
// kernel: tpu_custom_call.1
= control target key start
LH: loop header
LB: loop body
LE: loop exit
PB: predicated region body
PF: predicated region fallthrough
CT: control target
= control target key end

     0   :  { %s1542_s0 = inlined_call_operand.hbm [shape: bf16[16,32], index: 0, kind: input, shape index: {}]   ;;  %s1543_s1 = inlined_call_operand.hbm [shape: bf16[16,32], index: 1, kind: input, shape index: {}]   ;;  %s1544_s2 = inlined_call_operand.hbm [shape: bf16[32,32], index: 2, kind: input, shape index: {}]   ;;  %s1545_s3 = inlined_call_operand.vmem [shape: f32[1,32], index: 3, kind: input, shape index: {}]   ;;  %s1546_s4 = inlined_call_operand.hbm [shape: bf16[32,32], index: 4, kind: input, shape index: {}]   ;;  %s1547_s5 = inlined_call_operand.vmem [shape: f32[1,32], index: 5, kind: input, shape index: {}]   ;;  %s1548_s6 = inlined_call_operand.vmem [shape: bf16[32,32], index: 6, kind: input, shape index: {}]   ;;  %s1549_s7 = inlined_call_operand.vmem [shape: f32[1,32], index: 7, kind: input, shape index: {}]   ;;  %s1550_s8 = inlined_call_operand.hbm [shape: f32[16,32], index: 8, kind: output, shape index: {}]  }
   0x1   :  { %1558 = sst [smem:[#allocation19_spill]] %s1544_s2 }
   0x2   :  { %1559 = sst [smem:[#allocation20_spill]] %s1546_s4 }
   0x3   :  { %13 = vsyncpa [#allocation3], 0 }
   0x4   :  { %15 = vsyncpa [#allocation3 + $0x1], 0 }
   0x5   :  { %16 = vsyncpa [#allocation6], 0 }
   0x6   :  { %18 = vsyncpa [#allocation6 + $0x1], 0 }
   0x7   :  { %19 = vsyncpa [#allocation9], 0 }
   0x8   :  { %20 = vsyncpa [#allocation4], 0 }
   0x9   :  { %22 = vsyncpa [#allocation4 + $0x1], 0  ;;  %s1240_s27 = smov 0   ;;  %s1242_s28 = smov 0  }
   0xa   :  { %s1244_s29 = smov 0   ;;  %s1246_s30 = smov 0  }
   0xb LB: > { %1560 = sst [smem:[#allocation16_spill]] %s1180_s29  ;;  %s1261_s9 = sadd.s32 4294967295, %s1184_s30   ;;  %s1184_s30 = sphi %s1246_s30, %s1581_s30   ;;  %s1180_s29 = sphi %s1244_s29, %s1583_s29   ;;  %s1176_s28 = sphi %s1242_s28, %s1585_s28   ;;  %s1172_s27 = sphi %s1240_s27, %s1584_s27  }
   0xc   : > { %s822_s10 = sadd.s32 4294967294, %s1184_s30   ;;  %p48_p0 = scmp.ne.s32.totalorder %s1176_s28, %s1172_s27 }
   0xd   : > { %p1551_p1 = scmp.eq.s32.totalorder %s1261_s9, 0  ;;  %p230_p3 = scmp.eq.s32.totalorder %s822_s10, 1 }
   0xe   : > { %p823_p5 = scmp.ge.s32.totalorder %s1184_s30, 1  ;;  %p237_p7 = scmp.lt.s32.totalorder %s1184_s30, 3 }
   0xf   : > { %p1270_p4 = por %p1551_p1, %p48_p0  ;;  %p1275_p6 = por %p230_p3, %p48_p0 }
  0x10   : > { %p1280_p8 = pnand %p823_p5, %p237_p7  ;;  %s1186_s14 = smov [#allocation7]  }
  0x11   : > { %s1561_s11 = scalar_select %p1270_p4, 1, 0 }
  0x12   : > { %s1562_s12 = scalar_select %p1275_p6, 1, 0 }
  0x13   : > { %s1563_s13 = scalar_select %p1280_p8, 1, 0 }
  0x14   : > { %s249_s15 = sshll.u32 %s1186_s14, 4  ;;  %p918_p9 = pneg %p1280_p8  ;;  %s1284_s15 = int_to_ptr.vmem [resolvable:$true] %s249_s15 }
  0x15   : > { %s1187_s17 = smov [#allocation8]   ;;  %s1565_s2 = sld [smem:[#allocation19_spill]] }
  0x16   : > { %p1291_p11 = pnand %p918_p9, %p1551_p1  ;;  %s265_s18 = sshll.u32 %s1187_s17, 4  ;;  %s1295_s18 = int_to_ptr.vmem [resolvable:$true] %s265_s18 }
  0x18   : > { %p992_p13 = pneg %p1291_p11 }
  0x1b   : > { %s990_s21 = scalar_lea.hbm %s1565_s2, 256 }
  0x1c   : > { %p991_p12 = scmp.ne.s32.totalorder %s1565_s2, %s990_s21  ;;  %p997_p5 = scmp.lt.u32.totalorder %s990_s21, %s1565_s2 }
  0x1e   : > { %p993_p0 = pnand %p992_p13, %p991_p12 }
  0x20   : > { %p994_p3 = pneg %p993_p0 }
  0x22   : > { %p999_p7 = pnand %p997_p5, %p994_p3 }
  0x24   : > { %1002 = shalt.err (!%p999_p7)
}
  0x25   : > { %s1003_s26 = scalar_lea.vmem %s1284_s15, 256  ;;  %p1011_p2 = scmp.lt.s32.totalorder %s1284_s15, %s1284_s15 }
  0x26   : > { %p1004_p9 = scmp.ne.s32.totalorder %s1284_s15, %s1003_s26  ;;  %p1012_p12 = scmp.lt.s32.totalorder %s1003_s26, %s1003_s26 }
  0x28   : > { %p1006_p10 = pnand %p1004_p9, %p992_p13  ;;  %p1013_p0 = por %p1012_p12, %p1011_p2 }
  0x2a   : > { %p1007_p1 = pneg %p1006_p10 }
  0x2c   : > { %p1014_p6 = pnand %p1013_p0, %p1007_p1 }
  0x2e   : > { %1017 = shalt.err (!%p1014_p6)
}
  0x2f   : > { %s1188_s10 = smov 64   ;;  %s1189_s14 = smov 4  }
  0x30   : > { %921 = dma.hbm_to_vmem [thread:$0]  (!%p1291_p11), %s1565_s2, 256, %s1284_s15, [#allocation6], %s1188_s10, %s1188_s10, %s1189_s14  }
  0x31   : > { %s1566_s4 = sld [smem:[#allocation20_spill]] }
  0x37   : > { %s1018_s22 = scalar_lea.hbm %s1566_s4, 256 }
  0x38   : > { %p1019_p2 = scmp.ne.s32.totalorder %s1566_s4, %s1018_s22  ;;  %p1025_p10 = scmp.lt.u32.totalorder %s1018_s22, %s1566_s4 }
  0x3a   : > { %p1021_p1 = pnand %p1019_p2, %p992_p13 }
  0x3c   : > { %p1022_p6 = pneg %p1021_p1 }
  0x3e   : > { %p1027_p3 = pnand %p1025_p10, %p1022_p6 }
  0x40   : > { %1030 = shalt.err (!%p1027_p3)
}
  0x41   : > { %s1031_s15 = scalar_lea.vmem %s1295_s18, 256  ;;  %p1039_p12 = scmp.lt.s32.totalorder %s1295_s18, %s1295_s18 }
  0x42   : > { %p1032_p5 = scmp.ne.s32.totalorder %s1295_s18, %s1031_s15  ;;  %p1040_p0 = scmp.lt.s32.totalorder %s1031_s15, %s1031_s15 }
  0x44   : > { %p1034_p7 = pnand %p1032_p5, %p992_p13  ;;  %p1041_p2 = por %p1040_p0, %p1039_p12 }
  0x46   : > { %p1035_p9 = pneg %p1034_p7 }
  0x48   : > { %p1042_p1 = pnand %p1041_p2, %p1035_p9 }
  0x4a   : > { %1045 = shalt.err (!%p1042_p1)
}
  0x4b   : > { %924 = dma.hbm_to_vmem [thread:$0]  (!%p1291_p11), %s1566_s4, 256, %s1295_s18, [#allocation9], %s1188_s10, %s1188_s10, %s1189_s14  }
  0x4c   : > { %s1350_s20 = sadd.s32 1, %s1184_s30   ;;  %s35_s16 = sadd.s32 1, %s1180_s29 }
  0x4d   : > { %1567 = sst [smem:[#allocation17_spill]] %s1350_s20  ;;  %s32_s21 = ssub.s32 %s1184_s30, %s1350_s20 }
  0x4e   : > { %p42_p13 = scmp.ne.s32.totalorder %s1180_s29, %s1176_s28  ;;  %p33_p6 = scmp.eq.s32.totalorder %s32_s21, 0 }
  0x4f   : > { %p43_p10 = scmp.eq.s32.totalorder %s1184_s30, 0  ;;  %p1568_p3 = scmp.eq.s32.totalorder %s1261_s9, 1 }
  0x50   : > { %p938_p7 = scmp.lt.s32.totalorder %s1184_s30, 2  ;;  %s288_s24 = sand.u32 1, %s1180_s29  }
  0x51   : > { %p1360_p5 = por %p1568_p3, %p42_p13  ;;  %p44_p9 = por %p43_p10, %p42_p13 }
  0x52   : > { %s1366_s23 = scalar_select %p33_p6, %s1180_s29, %s35_s16  }
  0x53   : > { %s1569_s22 = scalar_select %p1360_p5, 1, 0 }
  0x54   : > { %1570 = sst [smem:[#allocation18_spill]] %s1366_s23  ;;  %s1369_s18 = sshll.u32 %s288_s24, 2 }
  0x55   : > { %s828_s10 = sshll.u32 %s1184_s30, 6  ;;  %s292_s15 = scalar_lea.vmem [#allocation2], %s1369_s18 }
  0x56   : > { %s1375_s26 = scalar_lea.hbm %s1542_s0, %s828_s10  ;;  %s299_s17 = sshll.u32 %s292_s15, 4  ;;  %s1378_s17 = int_to_ptr.vmem [resolvable:$true] %s299_s17 }
  0x57   : > { %p1380_p11 = pnand %p938_p7, %p44_p9  ;;  %s1387_s14 = scalar_lea.hbm %s1543_s1, %s828_s10 }
  0x58   : > { %s306_s25 = sand.u32 1, %s1184_s30   ;;  %s289_s2 = scalar_lea.sflag [#allocation3], %s288_s24 }
  0x59   : > { %s1046_s4 = scalar_lea.hbm %s1375_s26, 64  ;;  %p1048_p0 = pneg %p1380_p11 }
  0x5a   : > { %p1047_p12 = scmp.ne.s32.totalorder %s1375_s26, %s1046_s4  ;;  %s1051_s29 = scalar_lea.hbm %s1542_s0, 128 }
  0x5b   : > { %p1052_p13 = scmp.lt.u32.totalorder %s1375_s26, %s1542_s0  ;;  %p1053_p6 = scmp.lt.u32.totalorder %s1051_s29, %s1046_s4 }
  0x5c   : > { %p1049_p2 = pnand %p1048_p0, %p1047_p12  ;;  %p1055_p3 = scmp.lt.u32.totalorder %s1046_s4, %s1375_s26 }
  0x5d   : > { %p1054_p10 = por %p1053_p6, %p1052_p13 }
  0x5e   : > { %p1050_p1 = pneg %p1049_p2 }
  0x5f   : > { %p1056_p7 = por %p1055_p3, %p1054_p10 }
  0x61   : > { %p1057_p9 = pnand %p1056_p7, %p1050_p1 }
  0x63   : > { %1060 = shalt.err (!%p1057_p9)
}
  0x64   : > { %s1061_s24 = scalar_lea.vmem %s1378_s17, 64  ;;  %s1190_s23 = smov [#allocation2]  }
  0x65   : > { %p1062_p12 = scmp.ne.s32.totalorder %s1378_s17, %s1061_s24  ;;  %s1066_s10 = sshll.u32 %s1190_s23, 4  ;;  %s1067_s10 = int_to_ptr.vmem [resolvable:$false] %s1066_s10 }
  0x66   : > { %s1068_s20 = scalar_lea.vmem %s1067_s10, 128  ;;  %p1069_p4 = scmp.lt.s32.totalorder %s1378_s17, %s1067_s10 }
  0x67   : > { %p1064_p2 = pnand %p1062_p12, %p1048_p0  ;;  %p1070_p13 = scmp.lt.s32.totalorder %s1068_s20, %s1061_s24 }
  0x69   : > { %p1065_p5 = pneg %p1064_p2  ;;  %p1071_p6 = por %p1070_p13, %p1069_p4 }
  0x6b   : > { %p1072_p10 = pnand %p1071_p6, %p1065_p5 }
  0x6d   : > { %1075 = shalt.err (!%p1072_p10)
}
  0x6e   : > { %928 = dma.hbm_to_vmem [thread:$0]  (!%p1380_p11), %s1375_s26, 64, %s1378_s17, %s289_s2  }
  0x6f   : > { %s310_s4 = scalar_lea.vmem [#allocation5], %s1369_s18  ;;  %s307_s21 = scalar_lea.sflag [#allocation6], %s306_s25 }
  0x70   : > { %s317_s29 = sshll.u32 %s310_s4, 4  ;;  %s1076_s15 = scalar_lea.hbm %s1387_s14, 64  ;;  %s318_s29 = int_to_ptr.vmem [resolvable:$true] %s317_s29 }
  0x71   : > { %p1077_p4 = scmp.ne.s32.totalorder %s1387_s14, %s1076_s15  ;;  %s1081_s23 = scalar_lea.hbm %s1543_s1, 128 }
  0x72   : > { %p1082_p3 = scmp.lt.u32.totalorder %s1387_s14, %s1543_s1  ;;  %p1083_p7 = scmp.lt.u32.totalorder %s1081_s23, %s1076_s15 }
  0x73   : > { %p1079_p5 = pnand %p1077_p4, %p1048_p0  ;;  %p1085_p12 = scmp.lt.u32.totalorder %s1076_s15, %s1387_s14 }
  0x74   : > { %p1084_p9 = por %p1083_p7, %p1082_p3 }
  0x75   : > { %p1080_p1 = pneg %p1079_p5 }
  0x76   : > { %p1086_p2 = por %p1085_p12, %p1084_p9 }
  0x78   : > { %p1087_p13 = pnand %p1086_p2, %p1080_p1 }
  0x7a   : > { %1090 = shalt.err (!%p1087_p13)
}
  0x7b   : > { %s1091_s2 = scalar_lea.vmem %s318_s29, 64  ;;  %s1191_s18 = smov [#allocation5]  }
  0x7c   : > { %p1092_p6 = scmp.ne.s32.totalorder %s318_s29, %s1091_s2  ;;  %s1096_s26 = sshll.u32 %s1191_s18, 4  ;;  %s1097_s26 = int_to_ptr.vmem [resolvable:$false] %s1096_s26 }
  0x7d   : > { %s1098_s17 = scalar_lea.vmem %s1097_s26, 128  ;;  %p1099_p5 = scmp.lt.s32.totalorder %s318_s29, %s1097_s26 }
  0x7e   : > { %p1094_p10 = pnand %p1092_p6, %p1048_p0  ;;  %p1100_p8 = scmp.lt.s32.totalorder %s1098_s17, %s1091_s2 }
  0x80   : > { %p1095_p4 = pneg %p1094_p10  ;;  %p1101_p3 = por %p1100_p8, %p1099_p5 }
  0x82   : > { %p1102_p7 = pnand %p1101_p3, %p1095_p4 }
  0x84   : > { %1105 = shalt.err (!%p1102_p7)
}
  0x85   : > { %931 = dma.hbm_to_vmem [thread:$0]  (!%p1380_p11), %s1387_s14, 64, %s318_s29, %s307_s21  }
  0x86   : > { %p1572_p1 = scmp.ne.s32.totalorder %s1563_s13, 0 }
  0x87   : > { %s1440_s25 = sand.u32 (!%p1572_p1), 1, %s1176_s28   ;;  %p1573_p8 = scmp.ne.s32.totalorder (!%p1572_p1), %s1561_s11, 0 }
  0x88   : > { %326 = sbr.rel (%p1572_p1) target bundleno = 1143 (0x477), region = 52  ;;  %s832_s4 = sshll.u32 (!%p1572_p1), %s1440_s25, 2 }
  0x89   : > { %s329_s15 = scalar_lea.sflag (!%p1572_p1), [#allocation3], %s1440_s25  ;;  %s1444_s16 = scalar_lea.vmem (!%p1572_p1), [#allocation2], %s832_s4 }
  0x8f   : > { %1151 = dma.done.wait (%p1573_p8), %s329_s15, 64  }
  0x90   : > { %1153 = vsyncadd (%p1573_p8), %s329_s15, 4294967232  ;;  %s337_s19 = sand.u32 1, %s1261_s9   ;;  %s341_s14 = scalar_lea.vmem [#allocation5], %s832_s4 }
  0x91   : > { %s338_s13 = scalar_lea.sflag [#allocation6], %s337_s19 }
  0x92   : > { %1155 = dma.done.wait (%p1573_p8), %s338_s13, 64  }
  0x93   : > { %1157 = vsyncadd (%p1573_p8), %s338_s13, 4294967232  ;;  %p1574_p11 = scmp.eq.s32.totalorder %s1261_s9, 0 }
  0x95   : > { %1159 = dma.done.wait (%p1574_p11), [#allocation6], 256   ;;  %p1575_p0 = pmov %p1574_p11 }
  0x97   : > { %1161 = vsyncadd (%p1575_p0), [#allocation6], 4294967040  ;;  %p1576_p9 = pmov %p1575_p0 }
  0x98   : > { %p1577_p12 = pmov %p1575_p0 }
  0x99   : > { %1163 = dma.done.wait (%p1576_p9), [#allocation9], 256  }
  0x9a   : > { %1165 = vsyncadd (%p1577_p12), [#allocation9], 4294967040  ;;  %v1192_v0 = vmov 0.0   ;;  %vm1193_vm0 = vmmov 0   ;;  %v980_v1 = vld [vmem:[#allocation8] sm:$0xff]   ;;  %v981_v2 = vld [vmem:[#allocation8 + $0x8] sm:$0xff]  }
  0x9b   : > { %876 = vmatprep.subr.bf16.mxu1 %v1192_v0  ;;  %868 = vmatprep.subr.bf16.mxu0 %v1192_v0  ;;  %v982_v3 = vld [vmem:[#allocation7] sm:$0xff]   ;;  %v983_v4 = vld [vmem:[#allocation7 + $0x8] sm:$0xff]   ;;  %v389_v5 = vld [vmem:[%s341_s14] sm:$0xf]  ;;  %vm413_vm1 = vcmask 261120   ;;  %vm635_vm2 = vcmask 64512  }
  0x9c   : > { %880 = vmatprep.mubr.msk.bf16.mxu1 %vm1193_vm0, %v1192_v0  ;;  %872 = vmatprep.mubr.msk.bf16.mxu0 %vm1193_vm0, %v1192_v0  ;;  %v388_v6 = vld [vmem:[%s1444_s16] sm:$0xf]  ;;  %v841_v7 = vld [vmem:[%s1547_s5] ss:$0 sm:$0xff]  ;;  %v985_v23 = vld [vmem:[%s1548_s6 + $0x8] sm:$0xff]   ;;  %vm651_vm3 = vcmask 1043456  }
  0x9d   : > { %877 = vmatpush3.bf16.msra.mxu1 %v980_v1  ;;  %869 = vmatpush3.bf16.msra.mxu0 %v982_v3  ;;  %v837_v12 = vld [vmem:[%s1545_s3] ss:$0 sm:$0xff]  ;;  %s836_s17 = sshll.u32 %s1440_s25, 3  ;;  %s852_s4 = sshll.u32 %s1261_s9, 7 }
  0x9e   : > { %878 = vmatprep.subr.bf16.mxu1 %v1192_v0  ;;  %870 = vmatprep.subr.bf16.mxu0 %v1192_v0  ;;  %v984_v22 = vld [vmem:[%s1548_s6] sm:$0xff]   ;;  %s386_s15 = scalar_lea.vmem [#allocation10], %s836_s17  ;;  %s1497_s14 = scalar_lea.hbm %s1550_s8, %s852_s4 }
  0x9f   : > { %v845_v37 = vld [vmem:[%s1549_s7] ss:$0 sm:$0xff]  ;;  %s710_s16 = sshll.u32 %s386_s15, 4  ;;  %s697_s11 = scalar_lea.sflag [#allocation4], %s1440_s25  ;;  %s1499_s16 = int_to_ptr.vmem [resolvable:$true] %s710_s16 }
  0xa0   : > { %s1106_s29 = scalar_lea.vmem %s1499_s16, 128  ;;  %p1578_p13 = scmp.ne.s32.totalorder %s1569_s22, 0 }
  0xa1   : > { %879 = vmatpush3.bf16.msra.mxu1 %v981_v2  ;;  %871 = vmatpush3.bf16.msra.mxu0 %v983_v4  ;;  %p1107_p2 = scmp.ne.s32.totalorder %s1499_s16, %s1106_s29  ;;  %s1194_s9 = smov [#allocation10]  }
  0xa2   : > { %892 = vmatprep.subr.bf16.mxu1 %v1192_v0  ;;  %884 = vmatprep.subr.bf16.mxu0 %v1192_v0  ;;  %s1110_s21 = sshll.u32 %s1194_s9, 4  ;;  %s1111_s21 = int_to_ptr.vmem [resolvable:$false] %s1110_s21 }
  0xa3   : > { %p1108_p6 = pnand %p1107_p2, %p1578_p13  ;;  %s1112_s24 = scalar_lea.vmem %s1111_s21, 256 }
  0xa4   : > { %881 = vmatmul.mubr.msk.bf16.vlgmr.msra.gmra.mrb[0].mxu1 %vm413_vm1, %v389_v5  ;;  %873 = vmatmul.mubr.msk.bf16.vlgmr.msra.gmra.mrb[0].mxu0 %vm413_vm1, %v388_v6  ;;  %p1113_p4 = scmp.lt.s32.totalorder %s1499_s16, %s1111_s21  ;;  %p1114_p5 = scmp.lt.s32.totalorder %s1112_s24, %s1106_s29 }
  0xa5   : > { %894 = vmatprep.mubr.msk.bf16.mxu1 %vm1193_vm0, %v1192_v0  ;;  %888 = vmatprep.mubr.msk.bf16.mxu0 %vm1193_vm0, %v1192_v0  ;;  %p1109_p10 = pneg %p1108_p6 }
  0xa6   : > { %885 = vmatpush3.bf16.msra.mxu0 %v984_v22  ;;  %p1115_p3 = por %p1114_p5, %p1113_p4 }
  0xa7   : > { %886 = vmatprep.subr.bf16.mxu0 %v1192_v0 }
  0xa8   : > { %p1116_p7 = pnand %p1115_p3, %p1109_p10 }
  0xaa   : > { %887 = vmatpush3.bf16.msra.mxu0 %v985_v23 }
  0xab   : > { %898 = vmatprep.subr.bf16.mxu0 %v1192_v0 }
  0xad   : > { %889 = vmatmul.mubr.msk.bf16.vlgmr.msra.gmra.mrb[4].mxu0 %vm413_vm1, %v389_v5 }
  0xae   : > { %900 = vmatprep.mubr.msk.bf16.mxu0 %vm1193_vm0, %v1192_v0 }
 0x177   : > { %v517_v8 = vpop.f32.mrb[0].mxu1  ;;  %v451_v13 = vpop.f32.mrb[0].mxu0 }
 0x178   : > { %v518_v9 = vadd.f32 %v841_v7, %v517_v8  ;;  %v882_v10 = vpop.f32.mrb[1].mxu1  ;;  %v874_v16 = vpop.f32.mrb[1].mxu0  ;;  %v452_v19 = vadd.f32 %v837_v12, %v451_v13 }
 0x179   : > { %v520_v11 = vpop.f32.mrb[2].mxu1  ;;  %v454_v17 = vpop.f32.mrb[2].mxu0 }
 0x17a   : > { %v587_v14 = vpack.c.bf16 %v518_v9, %v518_v9  ;;  %v883_v15 = vpop.f32.mrb[3].mxu1  ;;  %v875_v20 = vpop.f32.mrb[3].mxu0  ;;  %v586_v21 = vpack.c.bf16 %v452_v19, %v452_v19 }
 0x17c   : > { %v593_v18 = vsel %vm413_vm1, %v587_v14, 0 }
 0x17d   : > { %893 = vmatpush3.bf16.xpose.msra.mxu1 %v593_v18 }
 0x180   : > { %v580_v34 = vpop.f32.mrb[4].mxu0 }
 0x181   : > { %v890_v35 = vpop.f32.mrb[5].mxu0  ;;  %v581_v39 = vadd.f32 %v845_v37, %v580_v34 }
 0x182   : > { %v583_v36 = vpop.f32.mrb[6].mxu0 }
 0x183   : > { %v891_v38 = vpop.f32.mrb[7].mxu0  ;;  %v588_v40 = vpack.c.bf16 %v581_v39, %v581_v39 }
 0x184   : > { %895 = vmatmul.mubr.msk.bf16.vlgmr.msra.gmra.mrb[4].mxu1 %vm413_vm1, %v586_v21 }
 0x185   : > { %v653_v41 = vsel %vm651_vm3, %v588_v40, 0 }
 0x186   : > { %899 = vmatpush3.bf16.msra.mxu0 %v653_v41 }
 0x257   : > { %v629_v24 = vpop.f32.mrb[4].mxu1 }
 0x258   : > { %v896_v25 = vpop.f32.mrb[5].mxu1  ;;  %v636_v26 = vsel %vm635_vm2, %v629_v24, -inf }
 0x259   : > { %637 = vmax.xlane.f32.xlu0 %v636_v26  ;;  %v632_v27 = vpop.f32.mrb[6].mxu1 }
 0x25a   : > { %v897_v28 = vpop.f32.mrb[7].mxu1 }
 0x2e6   : > { %v638_v29 = vpop.xlane.xlu0 %637 }
 0x2e7   : > { %v639_v30 = vsub.f32 %v629_v24, %v638_v29 }
 0x2e9   : > { %v640_v31 = vmul.f32 1.442695, %v639_v30 }
 0x2eb   : > { %986 = vpow2.f32 %v640_v31 }
 0x2f5   : > { %v987_v32 = vpop.eup %986 }
 0x2f6   : > { %v642_v33 = vsel %vm635_vm2, %v987_v32, 0.0 }
 0x2f7   : > { %643 = vadd.xlane.f32.xlu0 %v642_v33 }
 0x384   : > { %v644_v42 = vpop.xlane.xlu0 %643 }
 0x385   : > { %988 = vrcp.f32 %v644_v42 }
 0x38f   : > { %v989_v43 = vpop.eup %988 }
 0x390   : > { %v646_v44 = vmul.f32 %v989_v43, %v987_v32 }
 0x392   : > { %v647_v45 = vpack.c.bf16 %v646_v44, %v646_v44 }
 0x394   : > { %901 = vmatmul.mubr.msk.bf16.vlgmr.msra.gmra.mrb[8].mxu0 %vm635_vm2, %v647_v45 }
 0x467   : > { %v689_v46 = vpop.f32.mrb[8].mxu0 }
 0x468   : > { %695 = vst.msk [vmem:[%s386_s15] sm:$0xff] %vm413_vm1, %v689_v46  ;;  %v902_v47 = vpop.f32.mrb[9].mxu0 }
 0x469   : > { %v692_v48 = vpop.f32.mrb[10].mxu0 }
 0x46a   : > { %1119 = shalt.err (!%p1116_p7)
}
 0x46b   : > { %s1120_s25 = scalar_lea.hbm %s1497_s14, 128  ;;  %s1124_s20 = scalar_lea.hbm %s1550_s8, 256 }
 0x46c   : > { %p1121_p1 = scmp.ne.s32.totalorder %s1497_s14, %s1120_s25  ;;  %p1125_p0 = scmp.lt.u32.totalorder %s1497_s14, %s1550_s8 }
 0x46d   : > { %p1126_p9 = scmp.lt.u32.totalorder %s1124_s20, %s1120_s25  ;;  %p1128_p2 = scmp.lt.u32.totalorder %s1120_s25, %s1497_s14 }
 0x46e   : > { %p1122_p8 = pnand %p1121_p1, %p1578_p13 }
 0x46f   : > { %p1127_p12 = por %p1126_p9, %p1125_p0 }
 0x470   : > { %p1123_p11 = pneg %p1122_p8 }
 0x471   : > { %p1129_p6 = por %p1128_p2, %p1127_p12 }
 0x473   : > { %p1130_p10 = pnand %p1129_p6, %p1123_p11 }
 0x475   : > { %1133 = shalt.err (!%p1130_p10)
}
 0x476   : > { %916 = dma.vmem_to_hbm [thread:$0]  (%p1578_p13), %s1499_s16, 128, %s1497_s14, %s697_s11   ;;  %v903_v49 = vpop.f32.mrb[11].mxu0 }
 0x477 PF: > { %s722_s26 = sand.u32 1, %s1172_s27   ;;  %p1579_p4 = scmp.ne.s32.totalorder %s1562_s12, 0 }
 0x478   : > { %p1580_p5 = scmp.ge.s32.totalorder %s1184_s30, 2  ;;  %s723_s17 = scalar_lea.sflag [#allocation4], %s722_s26 }
 0x47a   : > { %p933_p3 = pnand %p1580_p5, %p1579_p4 }
 0x47c   : > { %1167 = dma.done.wait (!%p933_p3), %s723_s17, 128  }
 0x47d   : > { %1169 = vsyncadd (!%p933_p3), %s723_s17, 4294967168  ;;  %s1581_s30 = sld [smem:[#allocation17_spill]]  ;;  %s1582_s4 = sld [smem:[#allocation16_spill]] }
 0x47e   : > { %s1583_s29 = sld [smem:[#allocation18_spill]]  ;;  %s1584_s27 = smov %s1176_s28 }
 0x483   : > { %p25_p7 = scmp.ge.s32.totalorder %s1581_s30, 4   ;;  %s1585_s28 = smov %s1582_s4 }
 0x485   :  { %27 = sbr.rel (!%p25_p7) target bundleno = 11 (0xb), region = 118 }
 0x48c   :  { %728 = vsyncpa [#allocation3], 1 }
 0x48d   :  { %730 = vsyncpa [#allocation3 + $0x1], 1 }
 0x48e   :  { %731 = vsyncpa [#allocation6], 1 }
 0x48f   :  { %733 = vsyncpa [#allocation6 + $0x1], 1 }
 0x490   :  { %734 = vsyncpa [#allocation9], 1 }
 0x491   :  { %735 = vsyncpa [#allocation4], 1 }
 0x492   :  { %737 = vsyncpa [#allocation4 + $0x1], 1 }

</bundles_post_ra>
